<compile_context>
chip_gen: v6e
topology: v6e:2x2x1
jax: 0.10.0
libtpu: 0.0.40
codegen_flags: <defaults>
</compile_context>

<pallas_src>
import functools

import jax
import jax.numpy as jnp
from jax.experimental import pallas as pl
from jax.experimental.pallas import tpu as pltpu


# --------------------------------------------------------------------------- #
# Kernel
# --------------------------------------------------------------------------- #
def _stacked_gru_kernel(x_ref, h_ref, w_ref, b_ref, out_ref, nh_ref, x_scr,
                        *, residual):
    """One grid step == one GRU layer.  x_scr carries the layer input (f32)."""
    l = pl.program_id(0)
    H = out_ref.shape[-1]

    # Layer 0: initialize the carried input from the kernel's x argument.
    @pl.when(l == 0)
    def _():
        x_scr[...] = x_ref[...].astype(jnp.float32)

    x = x_scr[...]                              # (B, H)  f32
    h = h_ref[0].astype(jnp.float32)            # (B, H)  f32

    # Single fused MXU matmul: (B, 2H) @ (2H, 4H) -> (B, 4H), f32 accumulate.
    xh = jnp.concatenate([x, h], axis=-1).astype(w_ref.dtype)
    g = jnp.dot(xh, w_ref[0], preferred_element_type=jnp.float32) + b_ref[0]

    r = jax.nn.sigmoid(g[:, 0 * H:1 * H])
    z = jax.nn.sigmoid(g[:, 1 * H:2 * H])
    n = jnp.tanh(g[:, 2 * H:3 * H] + r * g[:, 3 * H:4 * H])
    new_h = (1.0 - z) * n + z * h               # (B, H) f32

    nh_ref[0] = new_h.astype(nh_ref.dtype)

    # Next layer's input.  dropout(p=0) is the identity; residual only for l>0.
    if residual:
        gate = (l > 0).astype(jnp.float32)
        nxt = new_h + gate * x
    else:
        nxt = new_h
    x_scr[...] = nxt
    out_ref[...] = nxt.astype(out_ref.dtype)    # final write (last layer) wins


# --------------------------------------------------------------------------- #
# Wrapper
# --------------------------------------------------------------------------- #
@functools.partial(jax.jit, static_argnames=("residual",))
def stacked_cell_forward(inputs, hidden, packed_params, residual=False):
    """Mirror of StackedCell.forward (GRU cells, dropout p=0 -> identity).

    inputs        : (B, D_in)   with D_in <= H
    hidden        : (L, B, H)
    packed_params : {"w": (L, 2H, 4H) bf16, "b": (L, 1, 4H) f32}
    returns (output (B, H), next_hidden (L, B, H))
    """
    B, d_in = inputs.shape
    L, _, H = hidden.shape
    w, b = packed_params["w"], packed_params["b"]

    # Layer-0 weight rows beyond D_in are zero, so zero-pad x to (B, H).
    if d_in < H:
        inputs = jnp.pad(inputs, ((0, 0), (0, H - d_in)))
    # TODO(synk): D_in > H would need a wider packed weight slab (not needed here).

    kernel = functools.partial(_stacked_gru_kernel, residual=residual)
    out, next_hidden = pl.pallas_call(
        kernel,
        out_shape=(
            jax.ShapeDtypeStruct((B, H), hidden.dtype),
            jax.ShapeDtypeStruct((L, B, H), hidden.dtype),
        ),
        grid=(L,),
        in_specs=[
            pl.BlockSpec((B, H), lambda l: (0, 0)),              # x (layer 0 only)
            pl.BlockSpec((1, B, H), lambda l: (l, 0, 0)),        # hidden[l]
            pl.BlockSpec((1, 2 * H, 4 * H), lambda l: (l, 0, 0)),  # packed weights
            pl.BlockSpec((1, 1, 4 * H), lambda l: (l, 0, 0)),    # packed bias
        ],
        out_specs=(
            pl.BlockSpec((B, H), lambda l: (0, 0)),              # final output
            pl.BlockSpec((1, B, H), lambda l: (l, 0, 0)),        # next_hidden[l]
        ),
        scratch_shapes=[pltpu.VMEM((B, H), jnp.float32)],        # carried layer input
        compiler_params=pltpu.CompilerParams(
            dimension_semantics=("arbitrary",)),                 # layers are sequential
    )(inputs, hidden, w, b)
    return out, next_hidden


# --------------------------------------------------------------------------- #
# Parameter init (torch.nn.GRUCell-style) + packing for the fused kernel
# --------------------------------------------------------------------------- #
def init_stacked_cell_params(key, input_size, hidden_size, num_layers,
                             compute_dtype=jnp.bfloat16):
    """Returns (packed_params for the kernel, raw per-layer f32 params)."""
    H = hidden_size
    assert input_size <= H, "fused kernel packs the layer-0 input into H rows"
    bound = hidden_size ** -0.5
    raw, w_list, b_list = [], [], []
    in_sz = input_size
    for _ in range(num_layers):
        key, k1, k2, k3, k4 = jax.random.split(key, 5)
        w_ih = jax.random.uniform(k1, (3 * H, in_sz), jnp.float32, -bound, bound)
        w_hh = jax.random.uniform(k2, (3 * H, H), jnp.float32, -bound, bound)
        b_ih = jax.random.uniform(k3, (3 * H,), jnp.float32, -bound, bound)
        b_hh = jax.random.uniform(k4, (3 * H,), jnp.float32, -bound, bound)
        raw.append({"w_ih": w_ih, "w_hh": w_hh, "b_ih": b_ih, "b_hh": b_hh})

        # Pack one (2H, 4H) slab: rows [x-part ; h-part], cols [r, z, i_n, h_n].
        wih_t = jnp.zeros((H, 3 * H), jnp.float32).at[:in_sz].set(w_ih.T)  # (H, 3H)
        whh_t = w_hh.T                                                     # (H, 3H)
        zeros = jnp.zeros((H, H), jnp.float32)
        top = jnp.concatenate([wih_t[:, :2 * H], wih_t[:, 2 * H:], zeros], axis=1)
        bot = jnp.concatenate([whh_t[:, :2 * H], zeros, whh_t[:, 2 * H:]], axis=1)
        w_big = jnp.concatenate([top, bot], axis=0)                        # (2H, 4H)
        b_big = jnp.concatenate(
            [b_ih[:2 * H] + b_hh[:2 * H], b_ih[2 * H:], b_hh[2 * H:]])     # (4H,)

        w_list.append(w_big.astype(compute_dtype))
        b_list.append(b_big.reshape(1, 4 * H))                             # keep f32
        in_sz = H

    packed = {"w": jnp.stack(w_list, axis=0), "b": jnp.stack(b_list, axis=0)}
    return packed, raw


# --------------------------------------------------------------------------- #
# Pure-JAX reference (same math as torch StackedCell with GRUCell)
# --------------------------------------------------------------------------- #
def _reference_forward(inputs, hidden, raw_params, residual=False,
                       compute_dtype=jnp.float32):
    x = inputs
    nh = []
    for i in range(hidden.shape[0]):
        p = raw_params[i]
        h = hidden[i]
        H = h.shape[-1]
        gi = jnp.dot(x.astype(compute_dtype), p["w_ih"].T.astype(compute_dtype),
                     preferred_element_type=jnp.float32) + p["b_ih"]
        gh = jnp.dot(h.astype(compute_dtype), p["w_hh"].T.astype(compute_dtype),
                     preferred_element_type=jnp.float32) + p["b_hh"]
        r = jax.nn.sigmoid(gi[:, :H] + gh[:, :H])
        z = jax.nn.sigmoid(gi[:, H:2 * H] + gh[:, H:2 * H])
        n = jnp.tanh(gi[:, 2 * H:] + r * gh[:, 2 * H:])
        new_h = (1.0 - z) * n + z * h
        x = new_h + x if (i > 0 and residual) else new_h
        nh.append(new_h)
    return x, jnp.stack(nh, axis=0)


# --------------------------------------------------------------------------- #
if __name__ == "__main__":
    # Small TPU-tile-friendly shapes: batch=8, input=hidden=128, 3 layers.
    B, D_IN, H, L = 8, 128, 128, 3

    key = jax.random.PRNGKey(0)
    key, kx, kh, kp = jax.random.split(key, 4)
    inputs = jax.random.normal(kx, (B, D_IN), jnp.float32)
    hidden = jax.random.normal(kh, (L, B, H), jnp.float32)
    packed, raw = init_stacked_cell_params(kp, D_IN, H, L)

    for residual in (False, True):
        out, nh = stacked_cell_forward(inputs, hidden, packed, residual=residual)
        out = jax.block_until_ready(out)
        nh = jax.block_until_ready(nh)
        assert out.shape == (B, H) and nh.shape == (L, B, H)

        # Tight check: reference using the same bf16 dot operands / f32 gates.
        ref_out, ref_nh = _reference_forward(
            inputs, hidden, raw, residual=residual, compute_dtype=jnp.bfloat16)
        assert jnp.allclose(out, ref_out, atol=1e-4, rtol=1e-4)
        assert jnp.allclose(nh, ref_nh, atol=1e-4, rtol=1e-4)

        # Loose sanity check vs full-f32 math (bf16 matmul rounding only).
        f32_out, f32_nh = _reference_forward(
            inputs, hidden, raw, residual=residual, compute_dtype=jnp.float32)
        assert jnp.allclose(out, f32_out, atol=5e-2, rtol=5e-2)
        assert jnp.allclose(nh, f32_nh, atol=5e-2, rtol=5e-2)

    print("KERNEL_OK")
</pallas_src>

<mosaic_0001>
module attributes {stable_mosaic.version = 11 : i64} {
  func.func @_stacked_gru_kernel(%arg0: i32, %arg1: memref<8x128xf32, #tpu.memory_space<vmem>>, %arg2: memref<1x8x128xf32, #tpu.memory_space<vmem>>, %arg3: memref<1x256x512xbf16, #tpu.memory_space<vmem>>, %arg4: memref<1x1x512xf32, #tpu.memory_space<vmem>>, %arg5: memref<8x128xf32, #tpu.memory_space<vmem>>, %arg6: memref<1x8x128xf32, #tpu.memory_space<vmem>>, %arg7: memref<8x128xf32, #tpu.memory_space<vmem>>) attributes {dimension_semantics = [#tpu.dimension_semantics<arbitrary>], iteration_bounds = array<i64: 3>, scalar_prefetch = 0 : i64, scratch_operands = 1 : i64, tpu.core_type = #tpu.core_type<tc>, window_params = [{pipeline_mode = #tpu.pipeline_mode<synchronous>, transform_indices = @transform_0, window_bounds = array<i64: 8, 128>}, {transform_indices = @transform_1, window_bounds = array<i64: 1, 8, 128>}, {transform_indices = @transform_2, window_bounds = array<i64: 1, 256, 512>}, {transform_indices = @transform_3, window_bounds = array<i64: 1, 1, 512>}, {pipeline_mode = #tpu.pipeline_mode<synchronous>, transform_indices = @transform_4, window_bounds = array<i64: 8, 128>}, {transform_indices = @transform_5, window_bounds = array<i64: 1, 8, 128>}]} {
    %c0_i32 = arith.constant 0 : i32
    %0 = arith.cmpi eq, %arg0, %c0_i32 : i32
    %1 = arith.extui %0 : i1 to i32
    %c0_i32_0 = arith.constant 0 : i32
    %2 = arith.cmpi ne, %1, %c0_i32_0 : i32
    scf.if %2 {
      %c0_21 = arith.constant 0 : index
      %c0_22 = arith.constant 0 : index
      %42 = vector.load %arg1[%c0_21, %c0_22] : memref<8x128xf32, #tpu.memory_space<vmem>>, vector<8x128xf32>
      %c0_23 = arith.constant 0 : index
      %c0_24 = arith.constant 0 : index
      %43 = vector.load %arg7[%c0_23, %c0_24] : memref<8x128xf32, #tpu.memory_space<vmem>>, vector<8x128xf32>
      tpu.vector_store %arg7[%c0_23, %c0_24], %42 {strides = array<i32>} : memref<8x128xf32, #tpu.memory_space<vmem>>, vector<8x128xf32>,
    } else {
    }
    %c0 = arith.constant 0 : index
    %c0_1 = arith.constant 0 : index
    %3 = vector.load %arg7[%c0, %c0_1] : memref<8x128xf32, #tpu.memory_space<vmem>>, vector<8x128xf32>
    %c0_2 = arith.constant 0 : index
    %c0_3 = arith.constant 0 : index
    %c0_4 = arith.constant 0 : index
    %4 = vector.load %arg2[%c0_2, %c0_3, %c0_4] : memref<1x8x128xf32, #tpu.memory_space<vmem>>, vector<1x8x128xf32>
    %5 = vector.shape_cast %4 : vector<1x8x128xf32> to vector<8x128xf32>
    %6 = tpu.concatenate %3, %5 in 1 : vector<8x128xf32>, vector<8x128xf32> -> vector<8x256xf32>
    %7 = arith.truncf %6 : vector<8x256xf32> to vector<8x256xbf16>
    %c0_5 = arith.constant 0 : index
    %c0_6 = arith.constant 0 : index
    %c0_7 = arith.constant 0 : index
    %8 = vector.load %arg3[%c0_5, %c0_6, %c0_7] : memref<1x256x512xbf16, #tpu.memory_space<vmem>>, vector<1x256x512xbf16>
    %9 = vector.shape_cast %8 : vector<1x256x512xbf16> to vector<256x512xbf16>
    %cst = arith.constant dense<0.000000e+00> : vector<8x512xf32>
    %10 = tpu.matmul %7, %9, %cst {dimension_numbers = #tpu.dot_dimension_numbers<[1], [0], [0], [1], [0, 0, 1, 1], [], []>} : vector<8x256xbf16>, vector<256x512xbf16>, vector<8x512xf32> -> vector<8x512xf32>
    %c0_8 = arith.constant 0 : index
    %c0_9 = arith.constant 0 : index
    %c0_10 = arith.constant 0 : index
    %11 = vector.load %arg4[%c0_8, %c0_9, %c0_10] : memref<1x1x512xf32, #tpu.memory_space<vmem>>, vector<1x1x512xf32>
    %12 = vector.shape_cast %11 : vector<1x1x512xf32> to vector<1x512xf32>
    %13 = vector.broadcast %12 : vector<1x512xf32> to vector<8x512xf32>
    %14 = arith.addf %10, %13 : vector<8x512xf32>
    %15 = vector.extract_strided_slice %14 {offsets = [0, 0], sizes = [8, 128], strides = [1, 1]} : vector<8x512xf32> to vector<8x128xf32>
    %16 = arith.negf %15 : vector<8x128xf32>
    %17 = math.exp %16 : vector<8x128xf32>
    %cst_11 = arith.constant 1.000000e+00 : f32
    %18 = vector.broadcast %cst_11 : f32 to vector<8x128xf32>
    %19 = arith.addf %18, %17 : vector<8x128xf32>
    %20 = arith.divf %18, %19 : vector<8x128xf32>
    %21 = vector.extract_strided_slice %14 {offsets = [0, 128], sizes = [8, 128], strides = [1, 1]} : vector<8x512xf32> to vector<8x128xf32>
    %22 = arith.negf %21 : vector<8x128xf32>
    %23 = math.exp %22 : vector<8x128xf32>
    %cst_12 = arith.constant 1.000000e+00 : f32
    %24 = vector.broadcast %cst_12 : f32 to vector<8x128xf32>
    %25 = arith.addf %24, %23 : vector<8x128xf32>
    %26 = arith.divf %24, %25 : vector<8x128xf32>
    %27 = vector.extract_strided_slice %14 {offsets = [0, 256], sizes = [8, 128], strides = [1, 1]} : vector<8x512xf32> to vector<8x128xf32>
    %28 = vector.extract_strided_slice %14 {offsets = [0, 384], sizes = [8, 128], strides = [1, 1]} : vector<8x512xf32> to vector<8x128xf32>
    %29 = arith.mulf %20, %28 : vector<8x128xf32>
    %30 = arith.addf %27, %29 : vector<8x128xf32>
    %31 = math.tanh %30 : vector<8x128xf32>
    %cst_13 = arith.constant 1.000000e+00 : f32
    %32 = vector.broadcast %cst_13 : f32 to vector<8x128xf32>
    %33 = arith.subf %32, %26 : vector<8x128xf32>
    %34 = arith.mulf %33, %31 : vector<8x128xf32>
    %35 = arith.mulf %26, %5 : vector<8x128xf32>
    %36 = arith.addf %34, %35 : vector<8x128xf32>
    %c0_14 = arith.constant 0 : index
    %c0_15 = arith.constant 0 : index
    %c0_16 = arith.constant 0 : index
    %37 = vector.load %arg6[%c0_14, %c0_15, %c0_16] : memref<1x8x128xf32, #tpu.memory_space<vmem>>, vector<1x8x128xf32>
    %38 = vector.shape_cast %37 : vector<1x8x128xf32> to vector<8x128xf32>
    %39 = vector.shape_cast %36 : vector<8x128xf32> to vector<1x8x128xf32>
    tpu.vector_store %arg6[%c0_14, %c0_15, %c0_16], %39 {strides = array<i32>} : memref<1x8x128xf32, #tpu.memory_space<vmem>>, vector<1x8x128xf32>,
    %c0_17 = arith.constant 0 : index
    %c0_18 = arith.constant 0 : index
    %40 = vector.load %arg7[%c0_17, %c0_18] : memref<8x128xf32, #tpu.memory_space<vmem>>, vector<8x128xf32>
    tpu.vector_store %arg7[%c0_17, %c0_18], %36 {strides = array<i32>} : memref<8x128xf32, #tpu.memory_space<vmem>>, vector<8x128xf32>,
    %c0_19 = arith.constant 0 : index
    %c0_20 = arith.constant 0 : index
    %41 = vector.load %arg5[%c0_19, %c0_20] : memref<8x128xf32, #tpu.memory_space<vmem>>, vector<8x128xf32>
    tpu.vector_store %arg5[%c0_19, %c0_20], %36 {strides = array<i32>} : memref<8x128xf32, #tpu.memory_space<vmem>>, vector<8x128xf32>,
    return
  }
  func.func @transform_0(%arg0: i32) -> (i32, i32) {
    %c0_i32 = arith.constant 0 : i32
    %c0_i32_0 = arith.constant 0 : i32
    %c0_i32_1 = arith.constant 0 : i32
    return %c0_i32, %c0_i32_0 : i32, i32
  }
  func.func @transform_1(%arg0: i32) -> (i32, i32, i32) {
    %c0_i32 = arith.constant 0 : i32
    %c0_i32_0 = arith.constant 0 : i32
    %c0_i32_1 = arith.constant 0 : i32
    return %arg0, %c0_i32, %c0_i32_0 : i32, i32, i32
  }
  func.func @transform_2(%arg0: i32) -> (i32, i32, i32) {
    %c0_i32 = arith.constant 0 : i32
    %c0_i32_0 = arith.constant 0 : i32
    %c0_i32_1 = arith.constant 0 : i32
    return %arg0, %c0_i32, %c0_i32_0 : i32, i32, i32
  }
  func.func @transform_3(%arg0: i32) -> (i32, i32, i32) {
    %c0_i32 = arith.constant 0 : i32
    %c0_i32_0 = arith.constant 0 : i32
    %c0_i32_1 = arith.constant 0 : i32
    return %arg0, %c0_i32, %c0_i32_0 : i32, i32, i32
  }
  func.func @transform_4(%arg0: i32) -> (i32, i32) {
    %c0_i32 = arith.constant 0 : i32
    %c0_i32_0 = arith.constant 0 : i32
    %c0_i32_1 = arith.constant 0 : i32
    return %c0_i32, %c0_i32_0 : i32, i32
  }
  func.func @transform_5(%arg0: i32) -> (i32, i32, i32) {
    %c0_i32 = arith.constant 0 : i32
    %c0_i32_0 = arith.constant 0 : i32
    %c0_i32_1 = arith.constant 0 : i32
    return %arg0, %c0_i32, %c0_i32_0 : i32, i32, i32
  }
}

</mosaic_0001>

<bundles_post_ra>
// kernel: stacked_cell_forward.1
= control target key start
LH: loop header
LB: loop body
LE: loop exit
PB: predicated region body
PF: predicated region fallthrough
CT: control target
= control target key end

     0   :  { %s1870_s0 = inlined_call_operand.hbm [shape: f32[8,128], index: 0, kind: input, shape index: {}]   ;;  %s1871_s1 = inlined_call_operand.hbm [shape: f32[3,8,128], index: 1, kind: input, shape index: {}]   ;;  %s1872_s2 = inlined_call_operand.hbm [shape: bf16[3,256,512], index: 2, kind: input, shape index: {}]   ;;  %s1873_s3 = inlined_call_operand.hbm [shape: f32[3,1,512], index: 3, kind: input, shape index: {}]   ;;  %s1874_s4 = inlined_call_operand.hbm [shape: f32[8,128], index: 4, kind: output, shape index: {0}]   ;;  %s1875_s5 = inlined_call_operand.hbm [shape: f32[3,8,128], index: 5, kind: output, shape index: {1}]  }
   0x1   :  { %1882 = sst [smem:[#allocation19_spill]] %s1870_s0 }
   0x2   :  { %1883 = sst [smem:[#allocation20_spill]] %s1871_s1 }
   0x3   :  { %1884 = sst [smem:[#allocation21_spill]] %s1872_s2 }
   0x4   :  { %11 = vsyncpa [#allocation4], 0 }
   0x5   :  { %12 = vsyncpa [#allocation7], 0 }
   0x6   :  { %14 = vsyncpa [#allocation7 + $0x1], 0 }
   0x7   :  { %15 = vsyncpa [#allocation10], 0 }
   0x8   :  { %17 = vsyncpa [#allocation10 + $0x1], 0 }
   0x9   :  { %18 = vsyncpa [#allocation5], 0 }
   0xa   :  { %19 = vsyncpa [#allocation13], 0 }
   0xb   :  { %21 = vsyncpa [#allocation13 + $0x1], 0  ;;  %s1535_s18 = smov 0   ;;  %s1537_s19 = smov 0  }
   0xc   :  { %s1539_s20 = smov 0   ;;  %s1541_s21 = smov 0  }
   0xd LB: > { %s1556_s22 = sadd.s32 1, %s1495_s21   ;;  %s55_s23 = sadd.s32 1, %s1491_s20  ;;  %s1495_s21 = sphi %s1541_s21, %s1910_s21   ;;  %s1491_s20 = sphi %s1539_s20, %s1909_s20   ;;  %s1487_s19 = sphi %s1537_s19, %s1908_s19   ;;  %s1483_s18 = sphi %s1535_s18, %s1907_s18  }
   0xe   : > { %s52_s24 = ssub.s32 %s1495_s21, %s1556_s22  ;;  %p1876_p0 = scmp.ne.s32.totalorder %s1491_s20, %s1487_s19 }
   0xf   : > { %p53_p1 = scmp.eq.s32.totalorder %s52_s24, 0  ;;  %p63_p2 = scmp.eq.s32.totalorder %s1495_s21, 0 }
  0x10   : > { %p1138_p3 = scmp.lt.s32.totalorder %s1495_s21, 3  ;;  %s202_s26 = sand.u32 1, %s1495_s21  }
  0x11   : > { %s1566_s25 = scalar_select %p53_p1, %s1491_s20, %s55_s23  }
  0x12   : > { %p64_p4 = por %p63_p2, %p1876_p0  ;;  %s1573_s27 = sand.u32 1, %s1491_s20  }
  0x13   : > { %s1014_s28 = sshll.u32 %s1573_s27, 3  ;;  %s1015_s29 = sshll.u32 %s1495_s21, 7 }
  0x14   : > { %s1885_s1 = sld [smem:[#allocation20_spill]]  ;;  %s206_s8 = scalar_lea.vmem [#allocation6], %s1014_s28 }
  0x15   : > { %s213_s9 = sshll.u32 %s206_s8, 4  ;;  %p1582_p5 = pnand %p1138_p3, %p64_p4  ;;  %s214_s9 = int_to_ptr.vmem [resolvable:$true] %s213_s9 }
  0x16   : > { %s1016_s11 = sshll.u32 %s1573_s27, 9  ;;  %s1587_s12 = scalar_lea.sflag [#allocation7], %s202_s26 }
  0x17   : > { %p1593_p7 = pneg %p1582_p5 }
  0x1a   : > { %s1580_s7 = scalar_lea.hbm %s1885_s1, %s1015_s29  ;;  %s1290_s17 = scalar_lea.hbm %s1885_s1, 384 }
  0x1b   : > { %s1285_s13 = scalar_lea.hbm %s1580_s7, 128  ;;  %p1291_p10 = scmp.lt.s32.totalorder %s1580_s7, %s1885_s1 }
  0x1c   : > { %p1286_p6 = scmp.ne.s32.totalorder %s1580_s7, %s1285_s13  ;;  %p1292_p11 = scmp.lt.s32.totalorder %s1290_s17, %s1285_s13 }
  0x1e   : > { %p1288_p8 = pnand %p1593_p7, %p1286_p6  ;;  %p1293_p12 = por %p1292_p11, %p1291_p10 }
  0x20   : > { %p1289_p9 = pneg %p1288_p8 }
  0x22   : > { %p1294_p13 = pnand %p1293_p12, %p1289_p9 }
  0x24   : > { %1297 = shalt.err (!%p1294_p13)
}
  0x25   : > { %s1298_s26 = scalar_lea.vmem %s214_s9, 128  ;;  %s1497_s28 = smov [#allocation6]  }
  0x26   : > { %p1299_p1 = scmp.ne.s32.totalorder %s214_s9, %s1298_s26  ;;  %s1303_s29 = sshll.u32 %s1497_s28, 4  ;;  %s1304_s29 = int_to_ptr.vmem [resolvable:$false] %s1303_s29 }
  0x27   : > { %s1305_s30 = scalar_lea.vmem %s1304_s29, 256  ;;  %p1306_p4 = scmp.lt.s32.totalorder %s214_s9, %s1304_s29 }
  0x28   : > { %p1301_p2 = pnand %p1299_p1, %p1593_p7  ;;  %p1307_p6 = scmp.lt.s32.totalorder %s1305_s30, %s1298_s26 }
  0x2a   : > { %p1302_p3 = pneg %p1301_p2  ;;  %p1308_p8 = por %p1307_p6, %p1306_p4 }
  0x2c   : > { %p1309_p0 = pnand %p1308_p8, %p1302_p3 }
  0x2e   : > { %1312 = shalt.err (!%p1309_p0)
}
  0x2f   : > { %1126 = dma.hbm_to_vmem [thread:$0]  (!%p1582_p5), %s1580_s7, 128, %s214_s9, %s1587_s12  }
  0x30   : > { %s1613_s6 = sadd.s32 4294967295, %s1495_s21   ;;  %s1010_s8 = sadd.s32 4294967294, %s1495_s21  }
  0x31   : > { %p68_p0 = scmp.ne.s32.totalorder %s1487_s19, %s1483_s18  ;;  %p1877_p9 = scmp.eq.s32.totalorder %s1613_s6, 0 }
  0x32   : > { %p1878_p10 = scmp.eq.s32.totalorder %s1613_s6, 2  ;;  %p171_p11 = scmp.eq.s32.totalorder %s1010_s8, 2 }
  0x33   : > { %p1011_p12 = scmp.ge.s32.totalorder %s1495_s21, 1  ;;  %p1623_p13 = por %p1877_p9, %p68_p0 }
  0x34   : > { %p1889_p1 = scmp.ne.s32.totalorder %s1491_s20, %s1487_s19  ;;  %p1636_p3 = por %p171_p11, %p68_p0 }
  0x35   : > { %s1888_s13 = scalar_select %p1623_p13, 1, 0 }
  0x36   : > { %p1632_p2 = por %p1878_p10, %p1889_p1  ;;  %p178_p4 = scmp.lt.s32.totalorder %s1495_s21, 4 }
  0x37   : > { %s1891_s9 = scalar_select %p1636_p3, 1, 0 }
  0x38   : > { %s1890_s7 = scalar_select %p1632_p2, 1, 0 }
  0x39   : > { %p1642_p8 = pnand %p1011_p12, %p178_p4  ;;  %s1498_s16 = smov [#allocation3]  }
  0x3a   : > { %s191_s17 = sshll.u32 %s1498_s16, 4  ;;  %s1101_s23 = sshll.u32 %s1495_s21, 13  ;;  %s192_s17 = int_to_ptr.vmem [resolvable:$true] %s191_s17 }
  0x3b   : > { %s1892_s15 = scalar_select %p1642_p8, 1, 0 }
  0x3c   : > { %p1119_p9 = pneg %p1642_p8  ;;  %s1893_s2 = sld [smem:[#allocation21_spill]] }
  0x3d   : > { %s224_s29 = scalar_lea.vmem [#allocation8], %s1016_s11  ;;  %p1894_p0 = scmp.eq.s32.totalorder %s1613_s6, 0 }
  0x3e   : > { %s231_s30 = sshll.u32 %s224_s29, 4  ;;  %s1324_s8 = scalar_lea.vmem %s192_s17, 128  ;;  %s1658_s30 = int_to_ptr.vmem [resolvable:$true] %s231_s30 }
  0x3f   : > { %p1120_p11 = pnand %p1119_p9, %p1894_p0  ;;  %p1325_p1 = scmp.ne.s32.totalorder %s192_s17, %s1324_s8 }
  0x40   : > { %p1332_p6 = scmp.lt.s32.totalorder %s192_s17, %s192_s17  ;;  %p1333_p3 = scmp.lt.s32.totalorder %s1324_s8, %s1324_s8 }
  0x41   : > { %p1315_p12 = pneg %p1120_p11 }
  0x42   : > { %s1652_s28 = scalar_lea.hbm %s1893_s2, %s1101_s23  ;;  %p1334_p2 = por %p1333_p3, %p1332_p6 }
  0x43   : > { %p1327_p4 = pnand %p1325_p1, %p1315_p12 }
  0x45   : > { %p1328_p10 = pneg %p1327_p4 }
  0x47   : > { %p1335_p13 = pnand %p1334_p2, %p1328_p10 }
  0x49   : > { %1338 = shalt.err (!%p1335_p13)
}
  0x4a   : > { %s1895_s0 = sld [smem:[#allocation19_spill]]  ;;  %s1339_s11 = scalar_lea.hbm %s1652_s28, 8192 }
  0x4b   : > { %p1340_p9 = scmp.ne.s32.totalorder %s1652_s28, %s1339_s11  ;;  %s1344_s29 = scalar_lea.hbm %s1893_s2, 24576 }
  0x4c   : > { %p1345_p10 = scmp.lt.s32.totalorder %s1652_s28, %s1893_s2  ;;  %p1346_p13 = scmp.lt.s32.totalorder %s1344_s29, %s1339_s11 }
  0x4d   : > { %p1342_p0 = pnand %p1340_p9, %p1593_p7 }
  0x4e   : > { %p1347_p2 = por %p1346_p13, %p1345_p10 }
  0x4f   : > { %p1343_p8 = pneg %p1342_p0 }
  0x50   : > { %1122 = dma.hbm_to_vmem [thread:$0]  (!%p1120_p11), %s1895_s0, 128, %s192_s17, [#allocation4]  }
  0x51   : > { %p1348_p3 = pnand %p1347_p2, %p1343_p8 }
  0x53   : > { %1351 = shalt.err (!%p1348_p3)
}
  0x54   : > { %s1352_s17 = scalar_lea.vmem %s1658_s30, 8192  ;;  %s1499_s16 = smov [#allocation8]  }
  0x55   : > { %p1353_p6 = scmp.ne.s32.totalorder %s1658_s30, %s1352_s17  ;;  %s1357_s23 = sshll.u32 %s1499_s16, 4  ;;  %s1358_s23 = int_to_ptr.vmem [resolvable:$false] %s1357_s23 }
  0x56   : > { %s1359_s24 = scalar_lea.vmem %s1358_s23, 16384  ;;  %p1360_p1 = scmp.lt.s32.totalorder %s1658_s30, %s1358_s23 }
  0x57   : > { %p1355_p11 = pnand %p1353_p6, %p1593_p7  ;;  %p1361_p4 = scmp.lt.s32.totalorder %s1359_s24, %s1352_s17 }
  0x59   : > { %p1356_p12 = pneg %p1355_p11  ;;  %p1362_p9 = por %p1361_p4, %p1360_p1 }
  0x5b   : > { %p1363_p0 = pnand %p1362_p9, %p1356_p12 }
  0x5d   : > { %1366 = shalt.err (!%p1363_p0)
}
  0x5e   : > { %s1500_s1 = smov 256   ;;  %s1501_s11 = smov 16  }
  0x5f   : > { %1129 = dma.hbm_to_vmem [thread:$0]  (!%p1582_p5), %s1652_s28, 8192, %s1658_s30, %s1587_s12, %s1500_s1, %s1500_s1, %s1501_s11  }
  0x60   : > { %s1019_s26 = sshll.u32 %s1573_s27, 2  ;;  %s1102_s29 = sshll.u32 %s1495_s21, 6 }
  0x61   : > { %s1689_s17 = scalar_lea.hbm %s1873_s3, %s1102_s29  ;;  %s245_s23 = scalar_lea.vmem [#allocation9], %s1019_s26 }
  0x62   : > { %s253_s24 = sshll.u32 %s245_s23, 4  ;;  %s242_s0 = scalar_lea.sflag [#allocation10], %s1573_s27  ;;  %s254_s24 = int_to_ptr.vmem [resolvable:$true] %s253_s24 }
  0x63   : > { %s1367_s2 = scalar_lea.hbm %s1689_s17, 64  ;;  %s1372_s30 = scalar_lea.hbm %s1873_s3, 192 }
  0x64   : > { %p1368_p8 = scmp.ne.s32.totalorder %s1689_s17, %s1367_s2  ;;  %p1373_p2 = scmp.lt.s32.totalorder %s1689_s17, %s1873_s3 }
  0x65   : > { %p1374_p3 = scmp.lt.s32.totalorder %s1372_s30, %s1367_s2 }
  0x66   : > { %p1370_p10 = pnand %p1368_p8, %p1593_p7 }
  0x67   : > { %p1375_p6 = por %p1374_p3, %p1373_p2 }
  0x68   : > { %p1371_p13 = pneg %p1370_p10 }
  0x6a   : > { %p1376_p11 = pnand %p1375_p6, %p1371_p13 }
  0x6c   : > { %1379 = shalt.err (!%p1376_p11)
}
  0x6d   : > { %s1380_s26 = scalar_lea.vmem %s254_s24, 64  ;;  %s1502_s27 = smov [#allocation9]  }
  0x6e   : > { %p1381_p12 = scmp.ne.s32.totalorder %s254_s24, %s1380_s26  ;;  %s1385_s29 = sshll.u32 %s1502_s27, 4  ;;  %s1386_s29 = int_to_ptr.vmem [resolvable:$false] %s1385_s29 }
  0x6f   : > { %s1387_s8 = scalar_lea.vmem %s1386_s29, 128  ;;  %p1388_p9 = scmp.lt.s32.totalorder %s254_s24, %s1386_s29 }
  0x70   : > { %p1383_p1 = pnand %p1381_p12, %p1593_p7  ;;  %p1389_p0 = scmp.lt.s32.totalorder %s1387_s8, %s1380_s26 }
  0x72   : > { %p1384_p4 = pneg %p1383_p1  ;;  %p1390_p8 = por %p1389_p0, %p1388_p9 }
  0x74   : > { %p1391_p10 = pnand %p1390_p8, %p1384_p4 }
  0x76   : > { %1394 = shalt.err (!%p1391_p10)
}
  0x77   : > { %1132 = dma.hbm_to_vmem [thread:$0]  (!%p1582_p5), %s1689_s17, 64, %s254_s24, %s242_s0  }
  0x78   : > { %p1896_p13 = scmp.ne.s32.totalorder %s1892_s15, 0 }
  0x79   : > { %p1897_p2 = scmp.eq.s32.totalorder (!%p1896_p13), %s1613_s6, 0 }
  0x7a   : > { %262 = sbr.rel (%p1896_p13) target bundleno = 492 (0x1ec), region = 36 }
  0x7f   : > { %1462 = dma.done.wait (%p1897_p2), [#allocation4], 128   ;;  %p1898_p7 = pmov %p1897_p2 }
  0x80   : > { %s268_s2 = sand.u32 1, %s1613_s6   ;;  %s1716_s14 = sand.u32 1, %s1487_s19  }
  0x81   : > { %1464 = vsyncadd (%p1898_p7), [#allocation4], 4294967168  ;;  %s1024_s16 = sshll.u32 %s1716_s14, 3  ;;  %s269_s10 = scalar_lea.sflag [#allocation7], %s268_s2 }
  0x82   : > { %s1719_s23 = scalar_lea.vmem [#allocation6], %s1024_s16  ;;  %p1899_p5 = scmp.ne.s32.totalorder %s1888_s13, 0 }
  0x84   : > { %1466 = dma.done.wait (%p1899_p5), %s269_s10, 8320  }
  0x85   : > { %1468 = vsyncadd (%p1899_p5), %s269_s10, 4294958976  ;;  %s1025_s0 = sshll.u32 %s1716_s14, 9  ;;  %s1026_s15 = sshll.u32 %s1716_s14, 2 }
  0x86   : > { %s1727_s17 = scalar_lea.vmem [#allocation8], %s1025_s0  ;;  %s287_s24 = scalar_lea.sflag [#allocation10], %s1716_s14 }
  0x87   : > { %s1730_s12 = scalar_lea.vmem [#allocation9], %s1026_s15 }
  0x88   : > { %1470 = dma.done.wait (%p1899_p5), %s287_s24, 64  }
  0x89   : > { %1472 = vsyncadd (%p1899_p5), %s287_s24, 4294967232  ;;  %s1736_s28 = scalar_lea.vmem [#allocation12], %s1024_s16  ;;  %p1900_p3 = scmp.ne.s32.totalorder %s1613_s6, 0 }
  0x8b   : > { %330 = sbr.rel (%p1900_p3) target bundleno = 146 (0x92), region = 56 }
  0x90   : > { %v331_v0 = vld [vmem:[#allocation3] sm:$0xff] }
  0x91   : > { %332 = vst [vmem:[#allocation2] sm:$0xff] %v331_v0 }
  0x92 PF: > { %v1179_v1 = vld [vmem:[%s1727_s17 + $0xe4] ss:$16 sps:$4 sm:$0xff]   ;;  %v1181_v2 = vld [vmem:[%s1727_s17 + $0xe0] ss:$16 sps:$4 sm:$0xff]   ;;  %v1199_v8 = vld [vmem:[%s1727_s17 + $0xec] ss:$16 sps:$4 sm:$0xff]  }
  0x93   : > { %743 = vmatprep.subr.bf16.mxu0 %v1179_v1  ;;  %v1182_v3 = vld [vmem:[%s1727_s17 + $0xc4] ss:$16 sps:$4 sm:$0xff]   ;;  %v1184_v4 = vld [vmem:[%s1727_s17 + $0xc0] ss:$16 sps:$4 sm:$0xff]   ;;  %v1202_v9 = vld [vmem:[%s1727_s17 + $0xe8] ss:$16 sps:$4 sm:$0xff]   ;;  %784 = vmatprep.subr.bf16.mxu1 %v1199_v8 }
  0x94   : > { %744 = vmatpush1.bf16.msra.mxu0 %v1181_v2  ;;  %v1185_v5 = vld [vmem:[%s1727_s17 + $0xa4] ss:$16 sps:$4 sm:$0xff]   ;;  %v1187_v6 = vld [vmem:[%s1727_s17 + $0xa0] ss:$16 sps:$4 sm:$0xff]   ;;  %785 = vmatpush1.bf16.msra.mxu1 %v1202_v9  ;;  %v1205_v12 = vld [vmem:[%s1727_s17 + $0xcc] ss:$16 sps:$4 sm:$0xff]  }
  0x95   : > { %745 = vmatprep.subr.bf16.mxu0 %v1182_v3  ;;  %v1188_v7 = vld [vmem:[%s1727_s17 + $0x84] ss:$16 sps:$4 sm:$0xff]   ;;  %v1190_v10 = vld [vmem:[%s1727_s17 + $0x80] ss:$16 sps:$4 sm:$0xff]   ;;  %v1208_v13 = vld [vmem:[%s1727_s17 + $0xc8] ss:$16 sps:$4 sm:$0xff]   ;;  %786 = vmatprep.subr.bf16.mxu1 %v1205_v12 }
  0x96   : > { %v1191_v11 = vld [vmem:[%s1727_s17 + $0x64] ss:$16 sps:$4 sm:$0xff]   ;;  %v1193_v14 = vld [vmem:[%s1727_s17 + $0x60] ss:$16 sps:$4 sm:$0xff]   ;;  %v1211_v16 = vld [vmem:[%s1727_s17 + $0xac] ss:$16 sps:$4 sm:$0xff]  }
  0x97   : > { %v1194_v15 = vld [vmem:[%s1727_s17 + $0x44] ss:$16 sps:$4 sm:$0xff]   ;;  %v1214_v17 = vld [vmem:[%s1727_s17 + $0xa8] ss:$16 sps:$4 sm:$0xff]   ;;  %v1217_v18 = vld [vmem:[%s1727_s17 + $0x8c] ss:$16 sps:$4 sm:$0xff]  }
  0x98   : > { %746 = vmatpush1.bf16.msra.mxu0 %v1184_v4  ;;  %787 = vmatpush1.bf16.msra.mxu1 %v1208_v13  ;;  %v1196_v19 = vld [vmem:[%s1727_s17 + $0x40] ss:$16 sps:$4 sm:$0xff]   ;;  %v1197_v20 = vld [vmem:[%s1727_s17 + $0x24] ss:$16 sps:$4 sm:$0xff]   ;;  %v1220_v21 = vld [vmem:[%s1727_s17 + $0x88] ss:$16 sps:$4 sm:$0xff]  }
  0x99   : > { %747 = vmatprep.subr.bf16.mxu0 %v1185_v5  ;;  %788 = vmatprep.subr.bf16.mxu1 %v1211_v16  ;;  %v1223_v22 = vld [vmem:[%s1727_s17 + $0x6c] ss:$16 sps:$4 sm:$0xff]   ;;  %v1201_v23 = vld [vmem:[%s1727_s17 + $0x20] ss:$16 sps:$4 sm:$0xff]   ;;  %v1203_v24 = vld [vmem:[%s1727_s17 + $0x4] ss:$16 sps:$4 sm:$0xff]   ;;  %v403_v5 = vlaneseq }
  0x9a   : > { %v1226_v25 = vld [vmem:[%s1727_s17 + $0x68] ss:$16 sps:$4 sm:$0xff]   ;;  %v1229_v26 = vld [vmem:[%s1727_s17 + $0x4c] ss:$16 sps:$4 sm:$0xff]   ;;  %v1207_v27 = vld [vmem:[%s1727_s17] ss:$16 sps:$4 sm:$0xff]  }
  0x9b   : > { %v1209_v28 = vld [vmem:[%s1727_s17 + $0x1e4] ss:$16 sps:$4 sm:$0xff]   ;;  %v1232_v29 = vld [vmem:[%s1727_s17 + $0x48] ss:$16 sps:$4 sm:$0xff]   ;;  %v1235_v30 = vld [vmem:[%s1727_s17 + $0x2c] ss:$16 sps:$4 sm:$0xff]  }
  0x9c   : > { %748 = vmatpush1.bf16.msra.mxu0 %v1187_v6  ;;  %789 = vmatpush1.bf16.msra.mxu1 %v1214_v17  ;;  %v1213_v31 = vld [vmem:[%s1727_s17 + $0x1e0] ss:$16 sps:$4 sm:$0xff]   ;;  %v1215_v32 = vld [vmem:[%s1727_s17 + $0x1c4] ss:$16 sps:$4 sm:$0xff]   ;;  %v1238_v33 = vld [vmem:[%s1727_s17 + $0x28] ss:$16 sps:$4 sm:$0xff]  }
  0x9d   : > { %749 = vmatprep.subr.bf16.mxu0 %v1188_v7  ;;  %790 = vmatprep.subr.bf16.mxu1 %v1217_v18  ;;  %v1241_v34 = vld [vmem:[%s1727_s17 + $0xc] ss:$16 sps:$4 sm:$0xff]   ;;  %v1219_v36 = vld [vmem:[%s1727_s17 + $0x1c0] ss:$16 sps:$4 sm:$0xff]   ;;  %v1221_v38 = vld [vmem:[%s1727_s17 + $0x1a4] ss:$16 sps:$4 sm:$0xff]  }
  0x9e   : > { %v1775_v35 = vld [vmem:[%s1719_s23] sm:$0xff]  ;;  %v333_v62 = vld [vmem:[#allocation2] sm:$0xff]  ;;  %v404_v6 = vshrl.u32 %v403_v5, 7  ;;  %s1503_s13 = smov [#allocation11]   ;;  %s1097_s1 = sshll.u32 %s1613_s6, 7 }
  0x9f   : > { %v336_v37 = vpack.c.bf16 %v1775_v35, %v1775_v35  ;;  %v1244_v39 = vld [vmem:[%s1727_s17 + $0x8] ss:$16 sps:$4 sm:$0xff]   ;;  %v1247_v40 = vld [vmem:[%s1727_s17 + $0x1ec] ss:$16 sps:$4 sm:$0xff]   ;;  %v1225_v41 = vld [vmem:[%s1727_s17 + $0x1a0] ss:$16 sps:$4 sm:$0xff]   ;;  %v335_v1 = vpack.c.bf16 %v333_v62, %v333_v62  ;;  %s1816_s29 = scalar_lea.hbm %s1875_s5, %s1097_s1 }
  0xa0   : > { %750 = vmatpush1.bf16.msra.mxu0 %v1190_v10  ;;  %791 = vmatpush1.bf16.msra.mxu1 %v1220_v21  ;;  %v1227_v42 = vld [vmem:[%s1727_s17 + $0x184] ss:$16 sps:$4 sm:$0xff]   ;;  %v1250_v43 = vld [vmem:[%s1727_s17 + $0x1e8] ss:$16 sps:$4 sm:$0xff]   ;;  %v1253_v44 = vld [vmem:[%s1727_s17 + $0x1cc] ss:$16 sps:$4 sm:$0xff]  }
  0xa1   : > { %751 = vmatprep.subr.bf16.mxu0 %v1191_v11  ;;  %792 = vmatprep.subr.bf16.mxu1 %v1223_v22  ;;  %v1231_v45 = vld [vmem:[%s1727_s17 + $0x180] ss:$16 sps:$4 sm:$0xff]   ;;  %v1233_v46 = vld [vmem:[%s1727_s17 + $0x164] ss:$16 sps:$4 sm:$0xff]   ;;  %v1256_v47 = vld [vmem:[%s1727_s17 + $0x1c8] ss:$16 sps:$4 sm:$0xff]  }
  0xa2   : > { %775 = vmatprep.mubr.bf16.mxu0 %v336_v37  ;;  %816 = vmatprep.mubr.bf16.mxu1 %v336_v37  ;;  %v1257_v48 = vld [vmem:[%s1727_s17 + $0x1ac] ss:$16 sps:$4 sm:$0xff]   ;;  %v1237_v49 = vld [vmem:[%s1727_s17 + $0x160] ss:$16 sps:$4 sm:$0xff]   ;;  %v1239_v50 = vld [vmem:[%s1727_s17 + $0x144] ss:$16 sps:$4 sm:$0xff]  }
  0xa3   : > { %v1259_v51 = vld [vmem:[%s1727_s17 + $0x1a8] ss:$16 sps:$4 sm:$0xff]   ;;  %v1260_v52 = vld [vmem:[%s1727_s17 + $0x18c] ss:$16 sps:$4 sm:$0xff]   ;;  %v1243_v53 = vld [vmem:[%s1727_s17 + $0x140] ss:$16 sps:$4 sm:$0xff]  }
  0xa4   : > { %752 = vmatpush1.bf16.msra.mxu0 %v1193_v14  ;;  %793 = vmatpush1.bf16.msra.mxu1 %v1226_v25  ;;  %v1245_v54 = vld [vmem:[%s1727_s17 + $0x124] ss:$16 sps:$4 sm:$0xff]   ;;  %v1262_v55 = vld [vmem:[%s1727_s17 + $0x188] ss:$16 sps:$4 sm:$0xff]   ;;  %v1263_v56 = vld [vmem:[%s1727_s17 + $0x16c] ss:$16 sps:$4 sm:$0xff]  }
  0xa5   : > { %753 = vmatprep.subr.bf16.mxu0 %v1194_v15  ;;  %794 = vmatprep.subr.bf16.mxu1 %v1229_v26  ;;  %v1249_v57 = vld [vmem:[%s1727_s17 + $0x120] ss:$16 sps:$4 sm:$0xff]   ;;  %v1251_v58 = vld [vmem:[%s1727_s17 + $0x104] ss:$16 sps:$4 sm:$0xff]   ;;  %v1265_v59 = vld [vmem:[%s1727_s17 + $0x168] ss:$16 sps:$4 sm:$0xff]  }
  0xa6   : > { %v1266_v60 = vld [vmem:[%s1727_s17 + $0x14c] ss:$16 sps:$4 sm:$0xff]   ;;  %v1255_v61 = vld [vmem:[%s1727_s17 + $0x100] ss:$16 sps:$4 sm:$0xff]   ;;  %v1268_v63 = vld [vmem:[%s1727_s17 + $0x148] ss:$16 sps:$4 sm:$0xff]  }
  0xa7   : > { %v1269_v0 = vld [vmem:[%s1727_s17 + $0x12c] ss:$16 sps:$4 sm:$0xff]   ;;  %v1271_v2 = vld [vmem:[%s1727_s17 + $0x128] ss:$16 sps:$4 sm:$0xff]   ;;  %v405_v7 = vsub.s32 0, %v404_v6  ;;  %v409_v10 = vsub.s32 1, %v404_v6 }
  0xa8   : > { %754 = vmatpush1.bf16.msra.mxu0 %v1196_v19  ;;  %795 = vmatpush1.bf16.msra.mxu1 %v1232_v29  ;;  %v1272_v3 = vld [vmem:[%s1727_s17 + $0x10c] ss:$16 sps:$4 sm:$0xff]   ;;  %v1274_v4 = vld [vmem:[%s1727_s17 + $0x108] ss:$16 sps:$4 sm:$0xff]   ;;  %v401_v8 = vld [vmem:[%s1730_s12] sm:$0xf] }
  0xa9   : > { %755 = vmatprep.subr.bf16.mxu0 %v1197_v20  ;;  %796 = vmatprep.subr.bf16.mxu1 %v1235_v30  ;;  %v406_v9 = vrot.slane %v401_v8, %v405_v7  ;;  %v410_v15 = vrot.slane %v401_v8, %v409_v10  ;;  %v417_v26 = vsub.s32 3, %v404_v6  ;;  %s859_s30 = sshll.u32 %s1503_s13, 4  ;;  %s872_s11 = sshll.u32 %s1736_s28, 4  ;;  %s860_s30 = int_to_ptr.vmem [resolvable:$true] %s859_s30  ;;  %s1818_s11 = int_to_ptr.vmem [resolvable:$true] %s872_s11 }
  0xaa   : > { %s1395_s8 = scalar_lea.vmem %s860_s30, 128  ;;  %p1901_p11 = scmp.eq.s32.totalorder %s1613_s6, 2 }
  0xab   : > { %v418_v29 = vrot.slane %v401_v8, %v417_v26  ;;  %p1396_p6 = scmp.ne.s32.totalorder %s860_s30, %s1395_s8  ;;  %p1402_p4 = scmp.lt.s32.totalorder %s860_s30, %s860_s30 }
  0xac   : > { %756 = vmatpush1.bf16.msra.mxu0 %v1201_v23  ;;  %797 = vmatpush1.bf16.msra.mxu1 %v1238_v33  ;;  %p1403_p9 = scmp.lt.s32.totalorder %s1395_s8, %s1395_s8 }
  0xad   : > { %757 = vmatprep.subr.bf16.mxu0 %v1203_v24  ;;  %798 = vmatprep.subr.bf16.mxu1 %v1241_v34  ;;  %p1397_p12 = pnand %p1396_p6, %p1901_p11 }
  0xae   : > { %p1404_p0 = por %p1403_p9, %p1402_p4 }
  0xaf   : > { %p1398_p1 = pneg %p1397_p12 }
  0xb0   : > { %758 = vmatpush1.bf16.msra.mxu0 %v1207_v27  ;;  %799 = vmatpush1.bf16.msra.mxu1 %v1244_v39  ;;  %v413_v27 = vsub.s32 2, %v404_v6 }
  0xb1   : > { %759 = vmatprep.subr.bf16.mxu0 %v1209_v28  ;;  %800 = vmatprep.subr.bf16.mxu1 %v1247_v40  ;;  %p1405_p8 = pnand %p1404_p0, %p1398_p1 }
  0xb4   : > { %760 = vmatpush2.bf16.msra.mxu0 %v1213_v31  ;;  %801 = vmatpush2.bf16.msra.mxu1 %v1250_v43  ;;  %v414_v31 = vrot.slane %v401_v8, %v413_v27 }
  0xb5   : > { %761 = vmatprep.subr.bf16.mxu0 %v1215_v32  ;;  %802 = vmatprep.subr.bf16.mxu1 %v1253_v44 }
  0xb8   : > { %762 = vmatpush2.bf16.msra.mxu0 %v1219_v36  ;;  %803 = vmatpush2.bf16.msra.mxu1 %v1256_v47 }
  0xb9   : > { %763 = vmatprep.subr.bf16.mxu0 %v1221_v38  ;;  %804 = vmatprep.subr.bf16.mxu1 %v1257_v48 }
  0xbc   : > { %764 = vmatpush2.bf16.msra.mxu0 %v1225_v41  ;;  %805 = vmatpush2.bf16.msra.mxu1 %v1259_v51 }
  0xbd   : > { %765 = vmatprep.subr.bf16.mxu0 %v1227_v42  ;;  %806 = vmatprep.subr.bf16.mxu1 %v1260_v52 }
  0xc0   : > { %766 = vmatpush2.bf16.msra.mxu0 %v1231_v45  ;;  %807 = vmatpush2.bf16.msra.mxu1 %v1262_v55 }
  0xc1   : > { %767 = vmatprep.subr.bf16.mxu0 %v1233_v46  ;;  %808 = vmatprep.subr.bf16.mxu1 %v1263_v56 }
  0xc4   : > { %768 = vmatpush2.bf16.msra.mxu0 %v1237_v49  ;;  %809 = vmatpush2.bf16.msra.mxu1 %v1265_v59 }
  0xc5   : > { %769 = vmatprep.subr.bf16.mxu0 %v1239_v50  ;;  %810 = vmatprep.subr.bf16.mxu1 %v1266_v60 }
  0xc8   : > { %770 = vmatpush2.bf16.msra.mxu0 %v1243_v53  ;;  %811 = vmatpush2.bf16.msra.mxu1 %v1268_v63 }
  0xc9   : > { %771 = vmatprep.subr.bf16.mxu0 %v1245_v54  ;;  %812 = vmatprep.subr.bf16.mxu1 %v1269_v0 }
  0xcc   : > { %772 = vmatpush2.bf16.msra.mxu0 %v1249_v57  ;;  %813 = vmatpush2.bf16.msra.mxu1 %v1271_v2 }
  0xcd   : > { %773 = vmatprep.subr.bf16.mxu0 %v1251_v58  ;;  %814 = vmatprep.subr.bf16.mxu1 %v1272_v3 }
  0xd0   : > { %774 = vmatpush2.bf16.msra.mxu0 %v1255_v61  ;;  %815 = vmatpush2.bf16.msra.mxu1 %v1274_v4 }
  0xd3   : > { %776 = vmatmul.mubr.bf16.vlgmr.msra.gmra.mxu0 %v335_v1  ;;  %817 = vmatmul.mubr.bf16.vlgmr.msra.gmra.mxu1 %v335_v1 }
 0x193   : > { %v777_v11 = vpop.f32.mrf.mxu0  ;;  %v818_v19 = vpop.f32.mrf.mxu1 }
 0x194   : > { %v778_v12 = vadd.f32 %v777_v11, %v406_v9  ;;  %v819_v34 = vadd.f32 %v818_v19, %v414_v31 }
 0x195   : > { %v779_v13 = vpop.f32.mrf.mxu0  ;;  %v820_v21 = vpop.f32.mrf.mxu1 }
 0x196   : > { %v1093_v14 = vmul.f32 -1.442695, %v778_v12  ;;  %v780_v18 = vadd.f32 %v779_v13, %v410_v15  ;;  %v821_v32 = vadd.f32 %v820_v21, %v418_v29 }
 0x197   : > { %v781_v16 = vpop.f32.mrf.mxu0  ;;  %v822_v22 = vpop.f32.mrf.mxu1 }
 0x198   : > { %1275 = vpow2.f32 %v1093_v14  ;;  %v1094_v20 = vmul.f32 -1.442695, %v780_v18 }
 0x199   : > { %v782_v17 = vpop.f32.mrf.mxu0  ;;  %v823_v23 = vpop.f32.mrf.mxu1 }
 0x19a   : > { %1277 = vpow2.f32 %v1094_v20 }
 0x1a5   : > { %v1276_v24 = vpop.eup %1275 }
 0x1a6   : > { %v828_v25 = vadd.f32 1.0, %v1276_v24 }
 0x1a7   : > { %v1278_v28 = vpop.eup %1277 }
 0x1a8   : > { %1279 = vrcp.f32 %v828_v25  ;;  %v834_v30 = vadd.f32 1.0, %v1278_v28 }
 0x1aa   : > { %1281 = vrcp.f32 %v834_v30 }
 0x1b5   : > { %v1280_v33 = vpop.eup %1279 }
 0x1b6   : > { %v837_v36 = vmul.f32 %v1280_v33, %v821_v32 }
 0x1b7   : > { %v1282_v38 = vpop.eup %1281 }
 0x1b8   : > { %v838_v37 = vadd.f32 %v837_v36, %v819_v34  ;;  %v840_v39 = vsub.f32 1.0, %v1282_v38  ;;  %v842_v42 = vmul.f32 %v1282_v38, %v1775_v35 }
 0x1ba   : > { %1283 = vtanh.f32 %v838_v37 }
 0x1c7   : > { %v1284_v40 = vpop.eup %1283 }
 0x1c8   : > { %v841_v41 = vmul.f32 %v1284_v40, %v840_v39 }
 0x1ca   : > { %v843_v43 = vadd.f32 %v842_v42, %v841_v41 }
 0x1cc   : > { %845 = vst [vmem:[#allocation2] sm:$0xff] %v843_v43  ;;  %846 = vst [vmem:[#allocation11] sm:$0xff] %v843_v43 }
 0x1cd   : > { %844 = vst [vmem:[%s1736_s28] sm:$0xff] %v843_v43 }
 0x1ce   : > { %1408 = shalt.err (!%p1405_p8)
}
 0x1cf   : > { %p1902_p10 = pmov %p1901_p11  ;;  %s848_s10 = scalar_lea.sflag [#allocation13], %s1716_s14 }
 0x1d0   : > { %s1419_s23 = scalar_lea.vmem %s1818_s11, 128  ;;  %p1903_p2 = scmp.ne.s32.totalorder %s1890_s7, 0 }
 0x1d1   : > { %1114 = dma.vmem_to_hbm [thread:$0]  (%p1902_p10), %s860_s30, 128, %s1874_s4, [#allocation5]  }
 0x1d2   : > { %p1420_p13 = scmp.ne.s32.totalorder %s1818_s11, %s1419_s23  ;;  %s1504_s0 = smov [#allocation12]  }
 0x1d3   : > { %s1423_s15 = sshll.u32 %s1504_s0, 4  ;;  %s1424_s15 = int_to_ptr.vmem [resolvable:$false] %s1423_s15 }
 0x1d4   : > { %p1421_p7 = pnand %p1420_p13, %p1903_p2  ;;  %s1425_s17 = scalar_lea.vmem %s1424_s15, 256 }
 0x1d5   : > { %p1426_p3 = scmp.lt.s32.totalorder %s1818_s11, %s1424_s15  ;;  %p1427_p6 = scmp.lt.s32.totalorder %s1425_s17, %s1419_s23 }
 0x1d6   : > { %p1422_p5 = pneg %p1421_p7 }
 0x1d7   : > { %p1428_p11 = por %p1427_p6, %p1426_p3 }
 0x1d9   : > { %p1429_p12 = pnand %p1428_p11, %p1422_p5 }
 0x1db   : > { %1432 = shalt.err (!%p1429_p12)
}
 0x1dc   : > { %s1433_s24 = scalar_lea.hbm %s1816_s29, 128  ;;  %s1437_s28 = scalar_lea.hbm %s1875_s5, 384 }
 0x1dd   : > { %p1434_p1 = scmp.ne.s32.totalorder %s1816_s29, %s1433_s24  ;;  %p1438_p0 = scmp.lt.s32.totalorder %s1816_s29, %s1875_s5 }
 0x1de   : > { %p1439_p8 = scmp.lt.s32.totalorder %s1437_s28, %s1433_s24 }
 0x1df   : > { %p1435_p4 = pnand %p1434_p1, %p1903_p2 }
 0x1e0   : > { %p1440_p10 = por %p1439_p8, %p1438_p0 }
 0x1e1   : > { %p1436_p9 = pneg %p1435_p4 }
 0x1e3   : > { %p1441_p13 = pnand %p1440_p10, %p1436_p9 }
 0x1e5   : > { %1444 = shalt.err (!%p1441_p13)
}
 0x1e6   : > { %1115 = dma.vmem_to_hbm [thread:$0]  (%p1903_p2), %s1818_s11, 128, %s1816_s29, %s848_s10  }
 0x1e7   : > { %p1904_p7 = scmp.eq.s32.totalorder %s1613_s6, 2 }
 0x1e9   : > { %1474 = dma.done.wait (%p1904_p7), [#allocation5], 128   ;;  %p1905_p5 = pmov %p1904_p7 }
 0x1eb   : > { %1476 = vsyncadd (%p1905_p5), [#allocation5], 4294967168 }
 0x1ec PF: > { %p1142_p3 = scmp.ge.s32.totalorder %s1495_s21, 2  ;;  %s888_s1 = sand.u32 1, %s1483_s18  }
 0x1ed   : > { %p1906_p6 = scmp.ne.s32.totalorder %s1891_s9, 0  ;;  %s889_s26 = scalar_lea.sflag [#allocation13], %s888_s1 }
 0x1ef   : > { %p1134_p11 = pnand %p1142_p3, %p1906_p6 }
 0x1f1   : > { %p1135_p12 = pneg %p1134_p11 }
 0x1f3   : > { %1478 = dma.done.wait (%p1135_p12), %s889_s26, 128  }
 0x1f4   : > { %1480 = vsyncadd (%p1135_p12), %s889_s26, 4294967168  ;;  %p24_p2 = scmp.ge.s32.totalorder %s1556_s22, 5   ;;  %s1907_s18 = smov %s1487_s19 }
 0x1f5   : > { %s1908_s19 = smov %s1491_s20  ;;  %s1909_s20 = smov %s1566_s25 }
 0x1f6   : > { %s1910_s21 = smov %s1556_s22  ;;  %26 = sbr.rel (!%p24_p2) target bundleno = 13 (0xd), region = 123 }
 0x1fb   :  { %894 = vsyncpa [#allocation4], 1 }
 0x1fc   :  { %896 = vsyncpa [#allocation4 + $0x1], 1 }
 0x1fd   :  { %897 = vsyncpa [#allocation7], 1 }
 0x1fe   :  { %899 = vsyncpa [#allocation7 + $0x1], 1 }
 0x1ff   :  { %900 = vsyncpa [#allocation10], 1 }
 0x200   :  { %902 = vsyncpa [#allocation10 + $0x1], 1 }
 0x201   :  { %903 = vsyncpa [#allocation5], 1 }
 0x202   :  { %905 = vsyncpa [#allocation5 + $0x1], 1 }
 0x203   :  { %906 = vsyncpa [#allocation13], 1 }
 0x204   :  { %908 = vsyncpa [#allocation13 + $0x1], 1 }

</bundles_post_ra>
